<compile_context>
chip_gen: v6e
topology: v6e:2x2x1
jax: 0.10.0
libtpu: 0.0.40
codegen_flags: <defaults>
</compile_context>

<pallas_src>
import jax
import jax.numpy as jnp
from jax import lax
from jax.experimental import pallas as pl
from jax.experimental.pallas import tpu as pltpu


# ---------------------------------------------------------------------------
# helpers
# ---------------------------------------------------------------------------
def _round_up(x, m):
    return ((x + m - 1) // m) * m


def _cdiv(a, b):
    return (a + b - 1) // b


def _vmem_budget():
    """Generation-aware scoped-VMEM request (v5e/v6e: 128 MiB -> 48 MiB; v7x: 64 MiB -> 40 MiB)."""
    try:
        cap = int(pltpu.get_tpu_info().vmem_capacity_bytes)
    except Exception:
        cap = 64 * 1024 * 1024          # conservative (v7x-sized) fallback
    return min(48 * 1024 * 1024, (cap * 5) // 8)


def _pick_bt(b_pad):
    """Largest multiple of 8 dividing B_pad, capped at 128, and capped at B_pad//2
    when B_pad >= 16 so the 'parallel' batch axis has >= 2 steps (both v7x TCs)."""
    cap = 128
    if b_pad >= 16:
        cap = min(cap, b_pad // 2)
    best = 8
    for d in range(8, cap + 1, 8):
        if b_pad % d == 0:
            best = d
    return best


def _pick_t_blk(t_run):
    """Timesteps per recurrence grid step (amortizes grid overhead, large gate DMAs)."""
    for cand in (32, 16, 8):
        if t_run % cand == 0 or t_run > 4 * cand:
            return cand
    return 8


# ---------------------------------------------------------------------------
# Kernel 1: batched input projection for both directions (bf16 gate stream out)
# ---------------------------------------------------------------------------
def input_proj_kernel(emb_ref, w_ref, b_ref, gf_ref, gb_ref):
    # emb_ref: (rt, E_pad) bf16   w_ref: (E_pad, 8*H_pad) bf16   b_ref: (1, 8*H_pad) f32
    # gf_ref / gb_ref: (rt, 4*H_pad) bf16
    G4 = gf_ref.shape[-1]
    acts = jnp.dot(emb_ref[...], w_ref[...],
                   preferred_element_type=jnp.float32) + b_ref[...]
    gf_ref[...] = acts[:, :G4].astype(gf_ref.dtype)     # lane-aligned split (multiple of 128)
    gb_ref[...] = acts[:, G4:].astype(gb_ref.dtype)


# ---------------------------------------------------------------------------
# Kernel 2: time-blocked masked bidirectional recurrence (fused block-diag W_hh)
# ---------------------------------------------------------------------------
def lstm_recurrence_kernel(gf_ref, gb_ref, len_ref, whh_ref, hout_ref,
                           hcat_ref, cf_ref, cb_ref):
    # gf_ref/gb_ref: (T_BLK, bt, 4*H_pad) bf16 gate slabs (fwd block tb, bwd block n_tb-1-tb)
    # len_ref: (bt, 1) i32   whh_ref: (2*H_pad, 8*H_pad) bf16 block-diagonal
    # hout_ref: (bt, 2*H_pad) f32 final [hf | hb]
    # hcat_ref: (bt, 2*H_pad) f32   cf_ref/cb_ref: (bt, H_pad) f32
    tb = pl.program_id(1)
    n_tb = pl.num_programs(1)
    H = cf_ref.shape[1]
    G4 = 4 * H
    T_BLK = gf_ref.shape[0]

    @pl.when(tb == 0)
    def _init():
        hcat_ref[...] = jnp.zeros_like(hcat_ref)
        cf_ref[...] = jnp.zeros_like(cf_ref)
        cb_ref[...] = jnp.zeros_like(cb_ref)

    lengths = len_ref[...]                                # (bt, 1) int32
    t_f0 = tb * T_BLK                                     # first fwd timestep in this block
    t_b0 = (n_tb - 1 - tb) * T_BLK                        # first timestep of the bwd slab

    def step(i, carry):
        h_cat = hcat_ref[...]                             # (bt, 2H) f32, pre-step state
        # ONE recurrent MXU issue for both directions (block-diagonal weight)
        rec = jnp.dot(h_cat.astype(jnp.bfloat16), whh_ref[...],
                      preferred_element_type=jnp.float32)          # (bt, 8H) f32
        gates_f = rec[:, :G4] + gf_ref[i].astype(jnp.float32)
        gates_b = rec[:, G4:] + gb_ref[T_BLK - 1 - i].astype(jnp.float32)

        def cell(gates, c_old):
            i_g = jax.nn.sigmoid(gates[:, 0:H])
            f_g = jax.nn.sigmoid(gates[:, H:2 * H])
            g_g = jnp.tanh(gates[:, 2 * H:3 * H])
            o_g = jax.nn.sigmoid(gates[:, 3 * H:4 * H])
            c_new = f_g * c_old + i_g * g_g
            return o_g * jnp.tanh(c_new), c_new

        hf_new, cf_new = cell(gates_f, cf_ref[...])
        hb_new, cb_new = cell(gates_b, cb_ref[...])

        mask_f = (t_f0 + i) < lengths                               # (bt, 1)
        mask_b = (t_b0 + T_BLK - 1 - i) < lengths
        hcat_ref[:, :H] = jnp.where(mask_f, hf_new, h_cat[:, :H])
        hcat_ref[:, H:] = jnp.where(mask_b, hb_new, h_cat[:, H:])
        cf_ref[...] = jnp.where(mask_f, cf_new, cf_ref[...])
        cb_ref[...] = jnp.where(mask_b, cb_new, cb_ref[...])
        return carry

    lax.fori_loop(0, T_BLK, step, 0, unroll=True)

    @pl.when(tb == n_tb - 1)
    def _finalize():
        hout_ref[...] = hcat_ref[...]


# ---------------------------------------------------------------------------
# Kernel 3: tiny classifier (hoisted out of the serial recurrence)
# ---------------------------------------------------------------------------
def classifier_kernel(h_ref, w_ref, b_ref, o_ref):
    o_ref[...] = (jnp.dot(h_ref[...].astype(jnp.bfloat16), w_ref[...],
                          preferred_element_type=jnp.float32) + b_ref[...])


# ---------------------------------------------------------------------------
# Parameter packing (one-time layout/padding work, outside the hot path)
# ---------------------------------------------------------------------------
def pack_params(params, pad_token_id):
    E = params["w_ih_f"].shape[0]
    H = params["w_hh_f"].shape[0]
    C = params["w_fc"].shape[1]
    E_pad = _round_up(E, 128)
    H_pad = _round_up(H, 128)
    C_pad = _round_up(C, 128)
    G4 = 4 * H_pad

    def pad_gate_cols(w):                       # (rows, 4H) -> (rows, 4*H_pad)
        r = w.shape[0]
        w4 = jnp.pad(w.reshape(r, 4, H), ((0, 0), (0, 0), (0, H_pad - H)))
        return w4.reshape(r, 4 * H_pad)

    def pad_rows(w, target):
        return jnp.pad(w, ((0, target - w.shape[0]), (0, 0)))

    # fused input-projection weight / bias for both directions: (E_pad, 8*H_pad)
    w_ih_f = pad_rows(pad_gate_cols(params["w_ih_f"]), E_pad)
    w_ih_b = pad_rows(pad_gate_cols(params["w_ih_b"]), E_pad)
    w_ih = jnp.concatenate([w_ih_f, w_ih_b], axis=1).astype(jnp.bfloat16)
    b_ih = jnp.concatenate([pad_gate_cols(params["b_f"]),
                            pad_gate_cols(params["b_b"])], axis=1).astype(jnp.float32)

    # block-diagonal recurrent weight: [hf | hb](bt,2H_pad) @ (2H_pad, 8H_pad)
    # -> one MXU issue per step for both directions (best for H_pad <= 256).
    w_hh_f = pad_rows(pad_gate_cols(params["w_hh_f"]), H_pad)
    w_hh_b = pad_rows(pad_gate_cols(params["w_hh_b"]), H_pad)
    w_hh = jnp.zeros((2 * H_pad, 8 * H_pad), jnp.float32)
    w_hh = w_hh.at[:H_pad, :G4].set(w_hh_f)
    w_hh = w_hh.at[H_pad:, G4:].set(w_hh_b)
    w_hh = w_hh.astype(jnp.bfloat16)

    w_fc = params["w_fc"]                                            # (2H, C)
    w_fc_p = jnp.zeros((2 * H_pad, C_pad), jnp.float32)
    w_fc_p = w_fc_p.at[:H, :C].set(w_fc[:H])
    w_fc_p = w_fc_p.at[H_pad:H_pad + H, :C].set(w_fc[H:])
    w_fc_p = w_fc_p.astype(jnp.bfloat16)
    b_fc_p = jnp.zeros((1, C_pad), jnp.float32).at[:, :C].set(params["b_fc"])

    emb_p = jnp.pad(params["embedding"],
                    ((0, 0), (0, E_pad - E))).astype(jnp.bfloat16)   # (V, E_pad)

    return dict(embedding=emb_p, w_ih=w_ih, b_ih=b_ih, w_hh=w_hh,
                w_fc=w_fc_p, b_fc=b_fc_p,
                H_pad=H_pad, num_classes=C, pad_token_id=pad_token_id)


# ---------------------------------------------------------------------------
# Forward wrapper
# ---------------------------------------------------------------------------
def lstm_classifier_forward(text, text_lengths, packed, max_time=None):
    """text: (B, T) int32; text_lengths: (B,) int32; max_time: optional Python int
    upper bound on sequence length (must be >= max(text_lengths))."""
    B, T = text.shape
    t_run = T if max_time is None else max(1, min(int(max_time), T))

    emb_tab = packed["embedding"]                       # (V, E_pad) bf16
    E_pad = emb_tab.shape[1]
    H_pad = packed["H_pad"]
    G4 = 4 * H_pad
    C_pad = packed["w_fc"].shape[1]
    C = packed["num_classes"]
    B_pad = _round_up(B, 8)

    vmem_limit = _vmem_budget()
    bt = _pick_bt(B_pad)
    n_bt = B_pad // bt

    # ---- recurrence time-blocking (cap so gate slabs + resident W_hh fit VMEM) ----
    t_blk = _pick_t_blk(t_run)
    whh_res = 2 * (2 * H_pad) * (8 * H_pad) * 2          # double-buffered resident bf16 W_hh
    while t_blk > 8 and 8 * t_blk * bt * G4 + whh_res + 4 * 1024 * 1024 > vmem_limit:
        t_blk //= 2                                      # 2 dirs x 2 bufs x bf16 gate slabs
    t_run_pad = _round_up(t_run, t_blk)
    n_tb = t_run_pad // t_blk

    # ---- kernel-1 chunking: cdiv grid + padded tail; resident weight in budget ----
    w_ih_res = 2 * int(packed["w_ih"].size) * 2          # double-buffered resident bf16 weight
    bytes_per_t = 2 * B_pad * (E_pad + 2 * G4) * 2       # dbl-buffered bf16 in + 2 bf16 outs
    chunk_budget = max(bytes_per_t, vmem_limit - w_ih_res - 2 * 1024 * 1024)
    t_chunk = max(1, min(t_run_pad, chunk_budget // bytes_per_t))
    if t_run_pad >= 2:                                   # >= 2 grid steps -> both v7x TCs busy
        t_chunk = min(t_chunk, _cdiv(t_run_pad, 2))
    n_chunks = _cdiv(t_run_pad, t_chunk)
    t_k1 = n_chunks * t_chunk                            # padded-tail time extent for kernel 1
    rt = t_chunk * B_pad
    rows = t_k1 * B_pad

    # ---- embedding gather (time-major; padded positions use the pad token) -------
    text_t = jnp.pad(text[:, :t_run].T, ((0, t_k1 - t_run), (0, B_pad - B)),
                     constant_values=packed["pad_token_id"])         # (t_k1, B_pad)
    emb2d = jnp.take(emb_tab, text_t, axis=0).reshape(rows, E_pad)   # bf16

    lengths2d = jnp.pad(text_lengths.astype(jnp.int32),
                        (0, B_pad - B)).reshape(B_pad, 1)            # padded rows: len 0

    # ---- Kernel 1: big input projection (both directions fused, bf16 out) --------
    gf2d, gb2d = pl.pallas_call(
        input_proj_kernel,
        out_shape=(jax.ShapeDtypeStruct((rows, G4), jnp.bfloat16),
                   jax.ShapeDtypeStruct((rows, G4), jnp.bfloat16)),
        grid=(rows // rt,),
        in_specs=[pl.BlockSpec((rt, E_pad), lambda i: (i, 0)),
                  pl.BlockSpec((E_pad, 2 * G4), lambda i: (0, 0)),
                  pl.BlockSpec((1, 2 * G4), lambda i: (0, 0))],
        out_specs=(pl.BlockSpec((rt, G4), lambda i: (i, 0)),
                   pl.BlockSpec((rt, G4), lambda i: (i, 0))),
        compiler_params=pltpu.CompilerParams(
            dimension_semantics=("parallel",),
            vmem_limit_bytes=vmem_limit),
    )(emb2d, packed["w_ih"], packed["b_ih"])

    # free reshape (leading-dim split) to time-major 3-D layout for the recurrence
    gf = gf2d.reshape(t_k1, B_pad, G4)
    gb = gb2d.reshape(t_k1, B_pad, G4)

    # ---- Kernel 2: time-blocked streamed recurrence -------------------------------
    hidden_pad = pl.pallas_call(
        lstm_recurrence_kernel,
        out_shape=jax.ShapeDtypeStruct((B_pad, 2 * H_pad), jnp.float32),
        grid=(n_bt, n_tb),
        in_specs=[pl.BlockSpec((t_blk, bt, G4), lambda b, t: (t, b, 0)),
                  pl.BlockSpec((t_blk, bt, G4), lambda b, t: (n_tb - 1 - t, b, 0)),
                  pl.BlockSpec((bt, 1), lambda b, t: (b, 0)),
                  pl.BlockSpec((2 * H_pad, 8 * H_pad), lambda b, t: (0, 0))],
        out_specs=pl.BlockSpec((bt, 2 * H_pad), lambda b, t: (b, 0)),
        scratch_shapes=[pltpu.VMEM((bt, 2 * H_pad), jnp.float32),
                        pltpu.VMEM((bt, H_pad), jnp.float32),
                        pltpu.VMEM((bt, H_pad), jnp.float32)],
        compiler_params=pltpu.CompilerParams(
            dimension_semantics=("parallel", "arbitrary"),
            vmem_limit_bytes=vmem_limit),
    )(gf, gb, lengths2d, packed["w_hh"])

    # ---- Kernel 3: classifier (hoisted out of the serial loop) --------------------
    logits_pad = pl.pallas_call(
        classifier_kernel,
        out_shape=jax.ShapeDtypeStruct((B_pad, C_pad), jnp.float32),
    )(hidden_pad, packed["w_fc"], packed["b_fc"])

    return logits_pad[:B, :C]


# ---------------------------------------------------------------------------
# Parameter creation (PyTorch-equivalent layout: gate order i,f,g,o; b_ih+b_hh folded)
# ---------------------------------------------------------------------------
def make_params(key, vocab_size, embedding_dim, hidden_dim, num_classes, pad_token_id):
    ks = jax.random.split(key, 10)
    H, E, C = hidden_dim, embedding_dim, num_classes
    s = 1.0 / jnp.sqrt(H)

    def u(k, shape):
        return jax.random.uniform(k, shape, jnp.float32, -s, s)

    emb = jax.random.normal(ks[0], (vocab_size, E), jnp.float32)
    emb = emb.at[pad_token_id].set(0.0)                 # padding_idx row zero

    return {
        "embedding": emb,
        "w_ih_f": u(ks[1], (E, 4 * H)),
        "w_hh_f": u(ks[2], (H, 4 * H)),
        "b_f":    u(ks[3], (1, 4 * H)) + u(ks[4], (1, 4 * H)),
        "w_ih_b": u(ks[5], (E, 4 * H)),
        "w_hh_b": u(ks[6], (H, 4 * H)),
        "b_b":    u(ks[7], (1, 4 * H)) + u(ks[8], (1, 4 * H)),
        "w_fc":   jax.random.uniform(ks[9], (2 * H, C), jnp.float32,
                                     -1.0 / jnp.sqrt(2 * H), 1.0 / jnp.sqrt(2 * H)),
        "b_fc":   jnp.zeros((1, C), jnp.float32),
    }


# ---------------------------------------------------------------------------
# Pure-JAX reference (same masked-recurrence semantics; mirrors the kernel's
# precision policy: bf16 matmul operands, bf16-stored input-gate pre-activations)
# ---------------------------------------------------------------------------
def reference_forward(text, text_lengths, params):
    bf = lambda x: x.astype(jnp.bfloat16)
    emb = jnp.take(params["embedding"], text, axis=0)            # (B, T, E) f32
    B, T, _ = emb.shape
    H = params["w_hh_f"].shape[0]
    lengths = text_lengths.reshape(B, 1)

    def cell(x, h, c, wi, wh, b):
        gx = jnp.dot(bf(x), bf(wi), preferred_element_type=jnp.float32) + b
        gx = gx.astype(jnp.bfloat16).astype(jnp.float32)         # bf16 gate stream
        g = gx + jnp.dot(bf(h), bf(wh), preferred_element_type=jnp.float32)
        i = jax.nn.sigmoid(g[:, 0:H])
        f = jax.nn.sigmoid(g[:, H:2 * H])
        gg = jnp.tanh(g[:, 2 * H:3 * H])
        o = jax.nn.sigmoid(g[:, 3 * H:4 * H])
        c_new = f * c + i * gg
        return o * jnp.tanh(c_new), c_new

    hf = cf = hb = cb = jnp.zeros((B, H), jnp.float32)
    for t in range(T):
        hn, cn = cell(emb[:, t], hf, cf, params["w_ih_f"], params["w_hh_f"], params["b_f"])
        m = t < lengths
        hf = jnp.where(m, hn, hf)
        cf = jnp.where(m, cn, cf)
        tb = T - 1 - t
        hn, cn = cell(emb[:, tb], hb, cb, params["w_ih_b"], params["w_hh_b"], params["b_b"])
        m = tb < lengths
        hb = jnp.where(m, hn, hb)
        cb = jnp.where(m, cn, cb)
    hidden = jnp.concatenate([hf, hb], axis=1)
    return (jnp.dot(bf(hidden), bf(params["w_fc"]),
                    preferred_element_type=jnp.float32) + params["b_fc"])


if __name__ == "__main__":
    VOCAB, EMB, HID, CLASSES, PAD = 50, 16, 32, 5, 0
    B, T = 2, 8

    key = jax.random.PRNGKey(0)
    kp, kt = jax.random.split(key)
    params = make_params(kp, VOCAB, EMB, HID, CLASSES, PAD)
    packed = pack_params(params, PAD)

    # lengths sorted descending (pack_padded_sequence with enforce_sorted=True)
    text_lengths = jnp.array([8, 5], dtype=jnp.int32)
    text = jax.random.randint(kt, (B, T), 1, VOCAB, dtype=jnp.int32)
    pos = jnp.arange(T)[None, :]
    text = jnp.where(pos < text_lengths[:, None], text, PAD)

    logits = lstm_classifier_forward(text, text_lengths, packed,
                                     max_time=int(text_lengths.max()))
    logits = jax.block_until_ready(logits)

    ref = reference_forward(text, text_lengths, params)
    assert logits.shape == (B, CLASSES)
    max_err = float(jnp.max(jnp.abs(logits - ref)))
    assert jnp.allclose(logits, ref, atol=2e-2, rtol=2e-2), \
        f"mismatch vs JAX reference (max abs err {max_err})"

    print("KERNEL_OK")
</pallas_src>

<mosaic_0001>
module attributes {stable_mosaic.version = 11 : i64} {
  func.func @input_proj_kernel(%arg0: i32, %arg1: memref<32x128xbf16, #tpu.memory_space<vmem>>, %arg2: memref<128x1024xbf16, #tpu.memory_space<vmem>>, %arg3: memref<1x1024xf32, #tpu.memory_space<vmem>>, %arg4: memref<32x512xbf16, #tpu.memory_space<vmem>>, %arg5: memref<32x512xbf16, #tpu.memory_space<vmem>>) attributes {dimension_semantics = [#tpu.dimension_semantics<parallel>], iteration_bounds = array<i64: 2>, scalar_prefetch = 0 : i64, scratch_operands = 0 : i64, tpu.core_type = #tpu.core_type<tc>, window_params = [{transform_indices = @transform_0, window_bounds = array<i64: 32, 128>}, {pipeline_mode = #tpu.pipeline_mode<synchronous>, transform_indices = @transform_1, window_bounds = array<i64: 128, 1024>}, {pipeline_mode = #tpu.pipeline_mode<synchronous>, transform_indices = @transform_2, window_bounds = array<i64: 1, 1024>}, {transform_indices = @transform_3, window_bounds = array<i64: 32, 512>}, {transform_indices = @transform_4, window_bounds = array<i64: 32, 512>}]} {
    %c0 = arith.constant 0 : index
    %c0_0 = arith.constant 0 : index
    %0 = vector.load %arg1[%c0, %c0_0] : memref<32x128xbf16, #tpu.memory_space<vmem>>, vector<32x128xbf16>
    %c0_1 = arith.constant 0 : index
    %c0_2 = arith.constant 0 : index
    %1 = vector.load %arg2[%c0_1, %c0_2] : memref<128x1024xbf16, #tpu.memory_space<vmem>>, vector<128x1024xbf16>
    %cst = arith.constant dense<0.000000e+00> : vector<32x1024xf32>
    %2 = tpu.matmul %0, %1, %cst {dimension_numbers = #tpu.dot_dimension_numbers<[1], [0], [0], [1], [0, 0, 1, 1], [], []>} : vector<32x128xbf16>, vector<128x1024xbf16>, vector<32x1024xf32> -> vector<32x1024xf32>
    %c0_3 = arith.constant 0 : index
    %c0_4 = arith.constant 0 : index
    %3 = vector.load %arg3[%c0_3, %c0_4] : memref<1x1024xf32, #tpu.memory_space<vmem>>, vector<1x1024xf32>
    %4 = vector.broadcast %3 : vector<1x1024xf32> to vector<32x1024xf32>
    %5 = arith.addf %2, %4 : vector<32x1024xf32>
    %6 = vector.extract_strided_slice %5 {offsets = [0, 0], sizes = [32, 512], strides = [1, 1]} : vector<32x1024xf32> to vector<32x512xf32>
    %7 = arith.truncf %6 : vector<32x512xf32> to vector<32x512xbf16>
    %c0_5 = arith.constant 0 : index
    %c0_6 = arith.constant 0 : index
    %8 = vector.load %arg4[%c0_5, %c0_6] : memref<32x512xbf16, #tpu.memory_space<vmem>>, vector<32x512xbf16>
    tpu.vector_store %arg4[%c0_5, %c0_6], %7 {strides = array<i32>} : memref<32x512xbf16, #tpu.memory_space<vmem>>, vector<32x512xbf16>,
    %9 = vector.extract_strided_slice %5 {offsets = [0, 512], sizes = [32, 512], strides = [1, 1]} : vector<32x1024xf32> to vector<32x512xf32>
    %10 = arith.truncf %9 : vector<32x512xf32> to vector<32x512xbf16>
    %c0_7 = arith.constant 0 : index
    %c0_8 = arith.constant 0 : index
    %11 = vector.load %arg5[%c0_7, %c0_8] : memref<32x512xbf16, #tpu.memory_space<vmem>>, vector<32x512xbf16>
    tpu.vector_store %arg5[%c0_7, %c0_8], %10 {strides = array<i32>} : memref<32x512xbf16, #tpu.memory_space<vmem>>, vector<32x512xbf16>,
    return
  }
  func.func @transform_0(%arg0: i32) -> (i32, i32) {
    %c0_i32 = arith.constant 0 : i32
    %c0_i32_0 = arith.constant 0 : i32
    return %arg0, %c0_i32 : i32, i32
  }
  func.func @transform_1(%arg0: i32) -> (i32, i32) {
    %c0_i32 = arith.constant 0 : i32
    %c0_i32_0 = arith.constant 0 : i32
    %c0_i32_1 = arith.constant 0 : i32
    return %c0_i32, %c0_i32_0 : i32, i32
  }
  func.func @transform_2(%arg0: i32) -> (i32, i32) {
    %c0_i32 = arith.constant 0 : i32
    %c0_i32_0 = arith.constant 0 : i32
    %c0_i32_1 = arith.constant 0 : i32
    return %c0_i32, %c0_i32_0 : i32, i32
  }
  func.func @transform_3(%arg0: i32) -> (i32, i32) {
    %c0_i32 = arith.constant 0 : i32
    %c0_i32_0 = arith.constant 0 : i32
    return %arg0, %c0_i32 : i32, i32
  }
  func.func @transform_4(%arg0: i32) -> (i32, i32) {
    %c0_i32 = arith.constant 0 : i32
    %c0_i32_0 = arith.constant 0 : i32
    return %arg0, %c0_i32 : i32, i32
  }
}

</mosaic_0001>

<bundles_post_ra>
// kernel: tpu_custom_call.1
= control target key start
LH: loop header
LB: loop body
LE: loop exit
PB: predicated region body
PF: predicated region fallthrough
CT: control target
= control target key end

     0   :  { %10 = vsyncpa [#allocation3], 0  ;;  %s1907_s0 = inlined_call_operand.hbm [shape: bf16[64,128], index: 0, kind: input, shape index: {}]   ;;  %s1908_s1 = inlined_call_operand.hbm [shape: bf16[128,1024], index: 1, kind: input, shape index: {}]   ;;  %s1909_s2 = inlined_call_operand.hbm [shape: f32[1,1024], index: 2, kind: input, shape index: {}]   ;;  %s1910_s3 = inlined_call_operand.hbm [shape: bf16[64,512], index: 3, kind: output, shape index: {0}]   ;;  %s1911_s4 = inlined_call_operand.hbm [shape: bf16[64,512], index: 4, kind: output, shape index: {1}]  }
   0x1   :  { %12 = vsyncpa [#allocation3 + $0x1], 0 }
   0x2   :  { %13 = vsyncpa [#allocation6], 0 }
   0x3   :  { %14 = vsyncpa [#allocation4], 0 }
   0x4   :  { %16 = vsyncpa [#allocation4 + $0x1], 0 }
   0x5   :  { %17 = vsyncpa [#allocation10], 0 }
   0x6   :  { %19 = vsyncpa [#allocation10 + $0x1], 0  ;;  %s1610_s15 = smov 0   ;;  %s1612_s16 = smov 0  }
   0x7   :  { %s1614_s17 = smov 0   ;;  %s1616_s18 = smov 0  }
   0x8 LB: > { %s1631_s19 = sadd.s32 4294967295, %s1571_s18   ;;  %s1185_s20 = sadd.s32 4294967294, %s1571_s18   ;;  %s1571_s18 = sphi %s1616_s18, %s1933_s18   ;;  %s1567_s17 = sphi %s1614_s17, %s1932_s17   ;;  %s1563_s16 = sphi %s1612_s16, %s1931_s16   ;;  %s1559_s15 = sphi %s1610_s15, %s1930_s15  }
   0x9   : > { %p45_p0 = scmp.ne.s32.totalorder %s1563_s16, %s1559_s15  ;;  %p1912_p1 = scmp.eq.s32.totalorder %s1631_s19, 0 }
   0xa   : > { %p117_p3 = scmp.eq.s32.totalorder %s1185_s20, 1  ;;  %p1186_p5 = scmp.ge.s32.totalorder %s1571_s18, 1 }
   0xb   : > { %p1640_p4 = por %p1912_p1, %p45_p0  ;;  %p150_p7 = scmp.lt.s32.totalorder %s1571_s18, 3 }
   0xc   : > { %p1645_p6 = por %p117_p3, %p45_p0  ;;  %s1573_s24 = smov [#allocation5]  }
   0xd   : > { %s1916_s21 = scalar_select %p1640_p4, 1, 0 }
   0xe   : > { %s1917_s22 = scalar_select %p1645_p6, 1, 0 }
   0xf   : > { %p1650_p8 = pnand %p1186_p5, %p150_p7  ;;  %s162_s25 = sshll.u32 %s1573_s24, 4  ;;  %s163_s25 = int_to_ptr.vmem [resolvable:$true] %s162_s25 }
  0x10   : > { %s1574_s27 = smov [#allocation7]   ;;  %s1404_s29 = scalar_lea.vmem %s163_s25, 8192 }
  0x11   : > { %s1918_s23 = scalar_select %p1650_p8, 1, 0 }
  0x12   : > { %p1326_p9 = pneg %p1650_p8  ;;  %s176_s28 = sshll.u32 %s1574_s27, 4  ;;  %s177_s28 = int_to_ptr.vmem [resolvable:$true] %s176_s28 }
  0x13   : > { %p1405_p13 = scmp.ne.s32.totalorder %s163_s25, %s1404_s29  ;;  %p1412_p5 = scmp.lt.s32.totalorder %s163_s25, %s163_s25 }
  0x14   : > { %p1659_p11 = pnand %p1326_p9, %p1912_p1  ;;  %p1413_p7 = scmp.lt.s32.totalorder %s1404_s29, %s1404_s29 }
  0x16   : > { %p1395_p12 = pneg %p1659_p11  ;;  %p1414_p10 = por %p1413_p7, %p1412_p5 }
  0x18   : > { %p1407_p0 = pnand %p1405_p13, %p1395_p12 }
  0x1a   : > { %p1408_p3 = pneg %p1407_p0 }
  0x1c   : > { %p1415_p9 = pnand %p1414_p10, %p1408_p3 }
  0x1e   : > { %1418 = shalt.err (!%p1415_p9)
}
  0x1f   : > { %s1575_s30 = smov 512   ;;  %s1576_s5 = smov 32  }
  0x20   : > { %1329 = dma.hbm_to_vmem [thread:$0]  (!%p1659_p11), %s1908_s1, 8192, %s163_s25, [#allocation6], %s1575_s30, %s1575_s30, %s1576_s5  }
  0x21   : > { %s1430_s8 = scalar_lea.vmem %s177_s28, 128  ;;  %p1438_p2 = scmp.lt.s32.totalorder %s177_s28, %s177_s28 }
  0x22   : > { %p1431_p1 = scmp.ne.s32.totalorder %s177_s28, %s1430_s8  ;;  %p1439_p6 = scmp.lt.s32.totalorder %s1430_s8, %s1430_s8 }
  0x24   : > { %p1433_p13 = pnand %p1431_p1, %p1395_p12  ;;  %p1440_p5 = por %p1439_p6, %p1438_p2 }
  0x26   : > { %p1434_p0 = pneg %p1433_p13 }
  0x28   : > { %p1441_p10 = pnand %p1440_p5, %p1434_p0 }
  0x2a   : > { %1444 = shalt.err (!%p1441_p10)
}
  0x2b   : > { %1332 = dma.hbm_to_vmem [thread:$0]  (!%p1659_p11), %s1909_s2, 128, %s177_s28, [#allocation6]  }
  0x2c   : > { %s1682_s11 = sadd.s32 1, %s1571_s18   ;;  %s32_s12 = sadd.s32 1, %s1567_s17 }
  0x2d   : > { %s29_s13 = ssub.s32 %s1571_s18, %s1682_s11  ;;  %p39_p1 = scmp.ne.s32.totalorder %s1567_s17, %s1563_s16 }
  0x2e   : > { %p30_p2 = scmp.eq.s32.totalorder %s29_s13, 0  ;;  %p40_p6 = scmp.eq.s32.totalorder %s1571_s18, 0 }
  0x2f   : > { %p1920_p12 = scmp.eq.s32.totalorder %s1631_s19, 1  ;;  %p1346_p7 = scmp.lt.s32.totalorder %s1571_s18, 2 }
  0x30   : > { %s1698_s20 = scalar_select %p30_p2, %s1567_s17, %s32_s12  }
  0x31   : > { %p1692_p3 = por %p1920_p12, %p39_p1  ;;  %p41_p9 = por %p40_p6, %p39_p1 }
  0x32   : > { %s187_s24 = sand.u32 1, %s1567_s17   ;;  %s1291_s26 = sshll.u32 %s1571_s18, 8 }
  0x33   : > { %s1921_s14 = scalar_select %p1692_p3, 1, 0 }
  0x34   : > { %s1190_s25 = sshll.u32 %s187_s24, 4  ;;  %s1705_s29 = scalar_lea.hbm %s1907_s0, %s1291_s26 }
  0x35   : > { %s191_s30 = scalar_lea.vmem [#allocation2], %s1190_s25  ;;  %p1709_p11 = pnand %p1346_p7, %p41_p9 }
  0x36   : > { %s198_s5 = sshll.u32 %s191_s30, 4  ;;  %s1713_s7 = scalar_lea.sflag [#allocation3], %s187_s24  ;;  %s1707_s5 = int_to_ptr.vmem [resolvable:$true] %s198_s5 }
  0x37   : > { %s1445_s8 = scalar_lea.hbm %s1705_s29, 256  ;;  %p1447_p0 = pneg %p1709_p11 }
  0x38   : > { %p1446_p13 = scmp.ne.s32.totalorder %s1705_s29, %s1445_s8  ;;  %s1450_s12 = scalar_lea.hbm %s1907_s0, 512 }
  0x39   : > { %p1451_p1 = scmp.lt.s32.totalorder %s1705_s29, %s1907_s0  ;;  %p1452_p2 = scmp.lt.s32.totalorder %s1450_s12, %s1445_s8 }
  0x3a   : > { %p1448_p5 = pnand %p1447_p0, %p1446_p13 }
  0x3b   : > { %p1453_p6 = por %p1452_p2, %p1451_p1 }
  0x3c   : > { %p1449_p10 = pneg %p1448_p5 }
  0x3e   : > { %p1454_p12 = pnand %p1453_p6, %p1449_p10 }
  0x40   : > { %1457 = shalt.err (!%p1454_p12)
}
  0x41   : > { %s1458_s24 = scalar_lea.vmem %s1707_s5, 256  ;;  %s1577_s26 = smov [#allocation2]  }
  0x42   : > { %p1459_p7 = scmp.ne.s32.totalorder %s1707_s5, %s1458_s24  ;;  %s1463_s27 = sshll.u32 %s1577_s26, 4  ;;  %s1464_s27 = int_to_ptr.vmem [resolvable:$false] %s1463_s27 }
  0x43   : > { %s1465_s28 = scalar_lea.vmem %s1464_s27, 512  ;;  %p1466_p5 = scmp.lt.s32.totalorder %s1707_s5, %s1464_s27 }
  0x44   : > { %p1461_p9 = pnand %p1459_p7, %p1447_p0  ;;  %p1467_p3 = scmp.lt.s32.totalorder %s1465_s28, %s1458_s24 }
  0x46   : > { %p1462_p13 = pneg %p1461_p9  ;;  %p1468_p4 = por %p1467_p3, %p1466_p5 }
  0x48   : > { %p1469_p8 = pnand %p1468_p4, %p1462_p13 }
  0x4a   : > { %1472 = shalt.err (!%p1469_p8)
}
  0x4b   : > { %s1578_s30 = smov 64   ;;  %s1579_s8 = smov 4  }
  0x4c   : > { %1336 = dma.hbm_to_vmem [thread:$0]  (!%p1709_p11), %s1705_s29, 256, %s1707_s5, %s1713_s7, %s1578_s30, %s1578_s30, %s1579_s8  }
  0x4d   : > { %p1923_p0 = scmp.ne.s32.totalorder %s1918_s23, 0 }
  0x4e   : > { %s1737_s9 = sand.u32 (!%p1923_p0), 1, %s1563_s16   ;;  %p1924_p4 = scmp.ne.s32.totalorder (!%p1923_p0), %s1916_s21, 0 }
  0x4f   : > { %210 = sbr.rel (%p1923_p0) target bundleno = 380 (0x17c), region = 32  ;;  %s1194_s10 = sshll.u32 (!%p1923_p0), %s1737_s9, 4 }
  0x50   : > { %s213_s12 = scalar_lea.sflag (!%p1923_p0), [#allocation3], %s1737_s9  ;;  %s1741_s13 = scalar_lea.vmem (!%p1923_p0), [#allocation2], %s1194_s10 }
  0x54   : > { %1542 = dma.done.wait (%p1924_p4), %s213_s12, 256  }
  0x55   : > { %1544 = vsyncadd (%p1924_p4), %s213_s12, 4294967040  ;;  %p1925_p8 = scmp.eq.s32.totalorder %s1631_s19, 0 }
  0x57   : > { %1546 = dma.done.wait (%p1925_p8), [#allocation6], 8320   ;;  %p1926_p3 = pmov %p1925_p8 }
  0x58   : > { %v1580_v0 = vmov 0   ;;  %v318_v1 = vld [vmem:[#allocation5 + $0x1c0] sm:$0xff]  ;;  %v319_v3 = vld [vmem:[#allocation5 + $0x1c8] sm:$0xff]  ;;  %v320_v63 = vld [vmem:[#allocation5 + $0x1d0] sm:$0xff]  ;;  %s1197_s21 = sshll.u32 %s1737_s9, 6  ;;  %s1309_s5 = sshll.u32 %s1631_s19, 10 }
  0x59   : > { %1548 = vsyncadd (%p1926_p3), [#allocation6], 4294958976  ;;  %732 = vmatprep.mubr.bf16.mxu0 %v1580_v0  ;;  %785 = vmatprep.mubr.bf16.mxu1 %v1580_v0  ;;  %v322_v2 = vld [vmem:[#allocation5 + $0x1e0] sm:$0xff]  ;;  %v323_v5 = vld [vmem:[#allocation5 + $0x1e8] sm:$0xff]  ;;  %s1788_s23 = scalar_lea.vmem [#allocation8], %s1197_s21  ;;  %s1805_s25 = scalar_lea.hbm %s1910_s3, %s1309_s5 }
  0x5a   : > { %v1258_v4 = vcombine.high %v318_v1, %v322_v2  ;;  %v1257_v6 = vcombine.low %v318_v1, %v322_v2  ;;  %v310_v7 = vld [vmem:[#allocation5 + $0x180] sm:$0xff]  ;;  %v1260_v9 = vcombine.high %v319_v3, %v323_v5  ;;  %v1259_v10 = vcombine.low %v319_v3, %v323_v5  ;;  %v311_v12 = vld [vmem:[#allocation5 + $0x188] sm:$0xff]  ;;  %v324_v1 = vld [vmem:[#allocation5 + $0x1f0] sm:$0xff]  ;;  %s1044_s29 = sshll.u32 %s1788_s23, 4  ;;  %s1025_s24 = scalar_lea.sflag [#allocation4], %s1737_s9  ;;  %s1797_s29 = int_to_ptr.vmem [resolvable:$true] %s1044_s29 }
  0x5b   : > { %v314_v8 = vld [vmem:[#allocation5 + $0x1a0] sm:$0xff]  ;;  %v315_v13 = vld [vmem:[#allocation5 + $0x1a8] sm:$0xff]  ;;  %v321_v2 = vld [vmem:[#allocation5 + $0x1d8] sm:$0xff]  ;;  %s1473_s26 = scalar_lea.vmem %s1797_s29, 1024  ;;  %p1927_p10 = scmp.ne.s32.totalorder %s1921_s14, 0 }
  0x5c   : > { %v1250_v11 = vcombine.high %v310_v7, %v314_v8  ;;  %v302_v14 = vld [vmem:[#allocation5 + $0x140] sm:$0xff]  ;;  %700 = vmatprep.subr.bf16.mxu0 %v1258_v4  ;;  %v1252_v15 = vcombine.high %v311_v12, %v315_v13  ;;  %v303_v17 = vld [vmem:[#allocation5 + $0x148] sm:$0xff]  ;;  %753 = vmatprep.subr.bf16.mxu1 %v1260_v9  ;;  %v1249_v19 = vcombine.low %v310_v7, %v314_v8  ;;  %v325_v3 = vld [vmem:[#allocation5 + $0x1f8] sm:$0xff]  ;;  %p1474_p11 = scmp.ne.s32.totalorder %s1797_s29, %s1473_s26  ;;  %s1581_s27 = smov [#allocation8]  }
  0x5d   : > { %v306_v16 = vld [vmem:[#allocation5 + $0x160] sm:$0xff]  ;;  %v307_v18 = vld [vmem:[#allocation5 + $0x168] sm:$0xff]  ;;  %701 = vmatpush1.bf16.msra.mxu0 %v1257_v6  ;;  %754 = vmatpush1.bf16.msra.mxu1 %v1259_v10  ;;  %v1251_v20 = vcombine.low %v311_v12, %v315_v13  ;;  %v1262_v6 = vcombine.high %v320_v63, %v324_v1  ;;  %v1264_v7 = vcombine.high %v321_v2, %v325_v3  ;;  %v312_v8 = vld [vmem:[#allocation5 + $0x190] sm:$0xff]  ;;  %s1477_s28 = sshll.u32 %s1581_s27, 4  ;;  %s1478_s28 = int_to_ptr.vmem [resolvable:$false] %s1477_s28 }
  0x5e   : > { %702 = vmatprep.subr.bf16.mxu0 %v1250_v11  ;;  %v1242_v21 = vcombine.high %v302_v14, %v306_v16  ;;  %755 = vmatprep.subr.bf16.mxu1 %v1252_v15  ;;  %v1244_v22 = vcombine.high %v303_v17, %v307_v18  ;;  %v294_v23 = vld [vmem:[#allocation5 + $0x100] sm:$0xff]  ;;  %v295_v25 = vld [vmem:[#allocation5 + $0x108] sm:$0xff]  ;;  %v1241_v27 = vcombine.low %v302_v14, %v306_v16  ;;  %v316_v9 = vld [vmem:[#allocation5 + $0x1b0] sm:$0xff]  ;;  %p1475_p1 = pnand %p1474_p11, %p1927_p10  ;;  %s1479_s30 = scalar_lea.vmem %s1478_s28, 2048 }
  0x5f   : > { %v298_v24 = vld [vmem:[#allocation5 + $0x120] sm:$0xff]  ;;  %v299_v26 = vld [vmem:[#allocation5 + $0x128] sm:$0xff]  ;;  %v1243_v28 = vcombine.low %v303_v17, %v307_v18  ;;  %v313_v11 = vld [vmem:[#allocation5 + $0x198] sm:$0xff]  ;;  %v1261_v13 = vcombine.low %v320_v63, %v324_v1  ;;  %v1263_v14 = vcombine.low %v321_v2, %v325_v3  ;;  %v1254_v15 = vcombine.high %v312_v8, %v316_v9  ;;  %p1480_p6 = scmp.lt.s32.totalorder %s1797_s29, %s1478_s28  ;;  %p1481_p12 = scmp.lt.s32.totalorder %s1479_s30, %s1473_s26 }
  0x60   : > { %v1234_v29 = vcombine.high %v294_v23, %v298_v24  ;;  %v1236_v30 = vcombine.high %v295_v25, %v299_v26  ;;  %v286_v31 = vld [vmem:[#allocation5 + $0xc0] sm:$0xff]  ;;  %v287_v33 = vld [vmem:[#allocation5 + $0xc8] sm:$0xff]  ;;  %v1233_v35 = vcombine.low %v294_v23, %v298_v24  ;;  %v1235_v36 = vcombine.low %v295_v25, %v299_v26  ;;  %v317_v12 = vld [vmem:[#allocation5 + $0x1b8] sm:$0xff]  ;;  %p1476_p2 = pneg %p1475_p1 }
  0x61   : > { %703 = vmatpush1.bf16.msra.mxu0 %v1249_v19  ;;  %756 = vmatpush1.bf16.msra.mxu1 %v1251_v20  ;;  %v290_v32 = vld [vmem:[#allocation5 + $0xe0] sm:$0xff]  ;;  %v291_v34 = vld [vmem:[#allocation5 + $0xe8] sm:$0xff]  ;;  %v1256_v16 = vcombine.high %v313_v11, %v317_v12  ;;  %v304_v17 = vld [vmem:[#allocation5 + $0x150] sm:$0xff]  ;;  %p1482_p7 = por %p1481_p12, %p1480_p6 }
  0x62   : > { %704 = vmatprep.subr.bf16.mxu0 %v1242_v21  ;;  %757 = vmatprep.subr.bf16.mxu1 %v1244_v22  ;;  %v1226_v37 = vcombine.high %v286_v31, %v290_v32  ;;  %v1228_v38 = vcombine.high %v287_v33, %v291_v34  ;;  %v278_v39 = vld [vmem:[#allocation5 + $0x80] sm:$0xff]  ;;  %v279_v41 = vld [vmem:[#allocation5 + $0x88] sm:$0xff]  ;;  %v1225_v43 = vcombine.low %v286_v31, %v290_v32  ;;  %v308_v18 = vld [vmem:[#allocation5 + $0x170] sm:$0xff] }
  0x63   : > { %v282_v40 = vld [vmem:[#allocation5 + $0xa0] sm:$0xff]  ;;  %v283_v42 = vld [vmem:[#allocation5 + $0xa8] sm:$0xff]  ;;  %v1227_v44 = vcombine.low %v287_v33, %v291_v34  ;;  %v305_v19 = vld [vmem:[#allocation5 + $0x158] sm:$0xff]  ;;  %v1253_v21 = vcombine.low %v312_v8, %v316_v9  ;;  %v1255_v22 = vcombine.low %v313_v11, %v317_v12  ;;  %v1246_v23 = vcombine.high %v304_v17, %v308_v18  ;;  %p1483_p9 = pnand %p1482_p7, %p1476_p2 }
  0x64   : > { %v1218_v45 = vcombine.high %v278_v39, %v282_v40  ;;  %v270_v46 = vld [vmem:[#allocation5 + $0x40] sm:$0xff]  ;;  %v1220_v47 = vcombine.high %v279_v41, %v283_v42  ;;  %v271_v49 = vld [vmem:[#allocation5 + $0x48] sm:$0xff]  ;;  %v1217_v51 = vcombine.low %v278_v39, %v282_v40  ;;  %v1219_v52 = vcombine.low %v279_v41, %v283_v42  ;;  %v309_v20 = vld [vmem:[#allocation5 + $0x178] sm:$0xff] }
  0x65   : > { %705 = vmatpush1.bf16.msra.mxu0 %v1241_v27  ;;  %758 = vmatpush1.bf16.msra.mxu1 %v1243_v28  ;;  %v274_v48 = vld [vmem:[#allocation5 + $0x60] sm:$0xff]  ;;  %v275_v50 = vld [vmem:[#allocation5 + $0x68] sm:$0xff]  ;;  %v1248_v24 = vcombine.high %v305_v19, %v309_v20  ;;  %v296_v25 = vld [vmem:[#allocation5 + $0x110] sm:$0xff]  ;;  %v1247_v31 = vcombine.low %v305_v19, %v309_v20 }
  0x66   : > { %706 = vmatprep.subr.bf16.mxu0 %v1234_v29  ;;  %759 = vmatprep.subr.bf16.mxu1 %v1236_v30  ;;  %v1210_v53 = vcombine.high %v270_v46, %v274_v48  ;;  %v1212_v54 = vcombine.high %v271_v49, %v275_v50  ;;  %v262_v55 = vld [vmem:[#allocation5] sm:$0xff]  ;;  %v263_v57 = vld [vmem:[#allocation5 + $0x8] sm:$0xff]  ;;  %v1209_v59 = vcombine.low %v270_v46, %v274_v48  ;;  %v300_v26 = vld [vmem:[#allocation5 + $0x130] sm:$0xff] }
  0x67   : > { %v266_v56 = vld [vmem:[#allocation5 + $0x20] sm:$0xff]  ;;  %v267_v58 = vld [vmem:[#allocation5 + $0x28] sm:$0xff]  ;;  %v1211_v60 = vcombine.low %v271_v49, %v275_v50  ;;  %v297_v27 = vld [vmem:[#allocation5 + $0x118] sm:$0xff]  ;;  %v1245_v30 = vcombine.low %v304_v17, %v308_v18  ;;  %v1238_v32 = vcombine.high %v296_v25, %v300_v26 }
  0x68   : > { %v1202_v61 = vcombine.high %v262_v55, %v266_v56  ;;  %v1204_v62 = vcombine.high %v263_v57, %v267_v58  ;;  %v1201_v4 = vcombine.low %v262_v55, %v266_v56  ;;  %v1203_v5 = vcombine.low %v263_v57, %v267_v58  ;;  %v1754_v10 = vld [vmem:[%s1741_s13] sm:$0xff]   ;;  %v301_v28 = vld [vmem:[#allocation5 + $0x138] sm:$0xff] }
  0x69   : > { %707 = vmatpush1.bf16.msra.mxu0 %v1233_v35  ;;  %760 = vmatpush1.bf16.msra.mxu1 %v1235_v36  ;;  %v1761_v29 = vld [vmem:[%s1741_s13 + $0x8] sm:$0xff]   ;;  %v1240_v33 = vcombine.high %v297_v27, %v301_v28  ;;  %v288_v34 = vld [vmem:[#allocation5 + $0xd0] sm:$0xff]  ;;  %v1239_v39 = vcombine.low %v297_v27, %v301_v28  ;;  %v1776_v8 = vld [vmem:[#allocation7] sm:$0xff] }
  0x6a   : > { %708 = vmatprep.subr.bf16.mxu0 %v1226_v37  ;;  %761 = vmatprep.subr.bf16.mxu1 %v1228_v38  ;;  %v292_v35 = vld [vmem:[#allocation5 + $0xf0] sm:$0xff]  ;;  %v289_v36 = vld [vmem:[#allocation5 + $0xd8] sm:$0xff]  ;;  %v1237_v38 = vcombine.low %v296_v25, %v300_v26 }
  0x6b   : > { %v293_v37 = vld [vmem:[#allocation5 + $0xf8] sm:$0xff]  ;;  %v1230_v40 = vcombine.high %v288_v34, %v292_v35  ;;  %v280_v42 = vld [vmem:[#allocation5 + $0x90] sm:$0xff]  ;;  %v1229_v46 = vcombine.low %v288_v34, %v292_v35 }
  0x6c   : > { %v1232_v41 = vcombine.high %v289_v36, %v293_v37  ;;  %v272_v50 = vld [vmem:[#allocation5 + $0x50] sm:$0xff] }
  0x6d   : > { %709 = vmatpush1.bf16.msra.mxu0 %v1225_v43  ;;  %762 = vmatpush1.bf16.msra.mxu1 %v1227_v44  ;;  %v284_v43 = vld [vmem:[#allocation5 + $0xb0] sm:$0xff]  ;;  %v281_v44 = vld [vmem:[#allocation5 + $0x98] sm:$0xff] }
  0x6e   : > { %710 = vmatprep.subr.bf16.mxu0 %v1218_v45  ;;  %763 = vmatprep.subr.bf16.mxu1 %v1220_v47  ;;  %v285_v45 = vld [vmem:[#allocation5 + $0xb8] sm:$0xff]  ;;  %v1231_v47 = vcombine.low %v289_v36, %v293_v37  ;;  %v1222_v48 = vcombine.high %v280_v42, %v284_v43  ;;  %v264_v58 = vld [vmem:[#allocation5 + $0x10] sm:$0xff] }
  0x6f   : > { %v1224_v49 = vcombine.high %v281_v44, %v285_v45  ;;  %v1223_v55 = vcombine.low %v281_v44, %v285_v45 }
  0x71   : > { %711 = vmatpush1.bf16.msra.mxu0 %v1217_v51  ;;  %764 = vmatpush1.bf16.msra.mxu1 %v1219_v52  ;;  %v276_v51 = vld [vmem:[#allocation5 + $0x70] sm:$0xff]  ;;  %v273_v52 = vld [vmem:[#allocation5 + $0x58] sm:$0xff] }
  0x72   : > { %712 = vmatprep.subr.bf16.mxu0 %v1210_v53  ;;  %765 = vmatprep.subr.bf16.mxu1 %v1212_v54  ;;  %v277_v53 = vld [vmem:[#allocation5 + $0x78] sm:$0xff]  ;;  %v1221_v54 = vcombine.low %v280_v42, %v284_v43  ;;  %v1214_v56 = vcombine.high %v272_v50, %v276_v51 }
  0x73   : > { %v1216_v57 = vcombine.high %v273_v52, %v277_v53  ;;  %v1215_v63 = vcombine.low %v273_v52, %v277_v53 }
  0x75   : > { %713 = vmatpush1.bf16.msra.mxu0 %v1209_v59  ;;  %766 = vmatpush1.bf16.msra.mxu1 %v1211_v60  ;;  %v268_v59 = vld [vmem:[#allocation5 + $0x30] sm:$0xff]  ;;  %v265_v60 = vld [vmem:[#allocation5 + $0x18] sm:$0xff] }
  0x76   : > { %714 = vmatprep.subr.bf16.mxu0 %v1202_v61  ;;  %767 = vmatprep.subr.bf16.mxu1 %v1204_v62  ;;  %v269_v61 = vld [vmem:[#allocation5 + $0x38] sm:$0xff]  ;;  %v1213_v62 = vcombine.low %v272_v50, %v276_v51  ;;  %v1206_v1 = vcombine.high %v264_v58, %v268_v59  ;;  %v1205_v3 = vcombine.low %v264_v58, %v268_v59 }
  0x77   : > { %v1208_v2 = vcombine.high %v265_v60, %v269_v61 }
  0x79   : > { %715 = vmatpush1.bf16.msra.mxu0 %v1201_v4  ;;  %768 = vmatpush1.bf16.msra.mxu1 %v1203_v5  ;;  %v1207_v4 = vcombine.low %v265_v60, %v269_v61  ;;  %v328_v5 = vlaneseq }
  0x7a   : > { %806 = vmatprep.subr.bf16.mxu0 %v1262_v6  ;;  %859 = vmatprep.subr.bf16.mxu1 %v1264_v7 }
  0x7b   : > { %v1773_v6 = vshrl.u32 %v328_v5, 7 }
  0x7c   : > { %733 = vmatmul.mubr.bf16.vlgmr.msra.gmra.mxu0 %v1754_v10  ;;  %786 = vmatmul.mubr.bf16.vlgmr.msra.gmra.mxu1 %v1754_v10 }
  0x7d   : > { %807 = vmatpush1.bf16.msra.mxu0 %v1261_v13  ;;  %860 = vmatpush1.bf16.msra.mxu1 %v1263_v14  ;;  %v330_v7 = vsub.s32 0, %v1773_v6  ;;  %v338_v9 = vsub.s32 2, %v1773_v6  ;;  %v342_v11 = vsub.s32 3, %v1773_v6 }
  0x7e   : > { %808 = vmatprep.subr.bf16.mxu0 %v1254_v15  ;;  %861 = vmatprep.subr.bf16.mxu1 %v1256_v16 }
  0x7f   : > { %742 = vmatprep.mubr.bf16.mxu0 %v1580_v0  ;;  %795 = vmatprep.mubr.bf16.mxu1 %v1580_v0  ;;  %v339_v12 = vrot.slane %v1776_v8, %v338_v9  ;;  %v343_v15 = vrot.slane %v1776_v8, %v342_v11 }
  0x81   : > { %809 = vmatpush1.bf16.msra.mxu0 %v1253_v21  ;;  %862 = vmatpush1.bf16.msra.mxu1 %v1255_v22 }
  0x82   : > { %810 = vmatprep.subr.bf16.mxu0 %v1246_v23  ;;  %863 = vmatprep.subr.bf16.mxu1 %v1248_v24 }
  0x84   : > { %743 = vmatmul.mubr.bf16.gmra.mxu0 %v1761_v29  ;;  %796 = vmatmul.mubr.bf16.gmra.mxu1 %v1761_v29 }
  0x85   : > { %811 = vmatpush1.bf16.msra.mxu0 %v1245_v30  ;;  %864 = vmatpush1.bf16.msra.mxu1 %v1247_v31 }
  0x86   : > { %812 = vmatprep.subr.bf16.mxu0 %v1238_v32  ;;  %865 = vmatprep.subr.bf16.mxu1 %v1240_v33 }
  0x87   : > { %838 = vmatprep.mubr.bf16.mxu0 %v1580_v0  ;;  %891 = vmatprep.mubr.bf16.mxu1 %v1580_v0 }
  0x89   : > { %813 = vmatpush1.bf16.msra.mxu0 %v1237_v38  ;;  %866 = vmatpush1.bf16.msra.mxu1 %v1239_v39 }
  0x8a   : > { %814 = vmatprep.subr.bf16.mxu0 %v1230_v40  ;;  %867 = vmatprep.subr.bf16.mxu1 %v1232_v41 }
  0x8d   : > { %815 = vmatpush1.bf16.msra.mxu0 %v1229_v46  ;;  %868 = vmatpush1.bf16.msra.mxu1 %v1231_v47 }
  0x8e   : > { %816 = vmatprep.subr.bf16.mxu0 %v1222_v48  ;;  %869 = vmatprep.subr.bf16.mxu1 %v1224_v49 }
  0x91   : > { %817 = vmatpush1.bf16.msra.mxu0 %v1221_v54  ;;  %870 = vmatpush1.bf16.msra.mxu1 %v1223_v55 }
  0x92   : > { %818 = vmatprep.subr.bf16.mxu0 %v1214_v56  ;;  %871 = vmatprep.subr.bf16.mxu1 %v1216_v57 }
  0x95   : > { %819 = vmatpush1.bf16.msra.mxu0 %v1213_v62  ;;  %872 = vmatpush1.bf16.msra.mxu1 %v1215_v63 }
  0x96   : > { %820 = vmatprep.subr.bf16.mxu0 %v1206_v1  ;;  %873 = vmatprep.subr.bf16.mxu1 %v1208_v2 }
  0x99   : > { %821 = vmatpush1.bf16.msra.mxu0 %v1205_v3  ;;  %874 = vmatpush1.bf16.msra.mxu1 %v1207_v4 }
  0x9c   : > { %839 = vmatmul.mubr.bf16.vlgmr.msra.gmra.mxu0 %v1754_v10  ;;  %892 = vmatmul.mubr.bf16.vlgmr.msra.gmra.mxu1 %v1754_v10  ;;  %v334_v10 = vsub.s32 1, %v1773_v6 }
  0x9d   : > { %848 = vmatprep.mubr.bf16.mxu0 %v1580_v0  ;;  %901 = vmatprep.mubr.bf16.mxu1 %v1580_v0  ;;  %v331_v0 = vrot.slane %v1776_v8, %v330_v7 }
  0x9e   : > { %v335_v13 = vrot.slane %v1776_v8, %v334_v10 }
  0xa4   : > { %849 = vmatmul.mubr.bf16.gmra.mxu0 %v1761_v29  ;;  %902 = vmatmul.mubr.bf16.gmra.mxu1 %v1761_v29 }
 0x13c   : > { %v734_v14 = vpop.f32.mrf.mxu0  ;;  %v787_v17 = vpop.f32.mrf.mxu1 }
 0x13d   : > { %v735_v16 = vadd.f32 %v734_v14, %v331_v0  ;;  %v788_v18 = vadd.f32 %v787_v17, %v339_v12 }
 0x13e   : > { %v736_v19 = vpop.f32.mrf.mxu0  ;;  %v789_v21 = vpop.f32.mrf.mxu1 }
 0x13f   : > { %v737_v20 = vadd.f32 %v736_v19, %v335_v13  ;;  %v790_v22 = vadd.f32 %v789_v21, %v343_v15 }
 0x140   : > { %v738_v23 = vpop.f32.mrf.mxu0  ;;  %v791_v25 = vpop.f32.mrf.mxu1 }
 0x141   : > { %v1292_v24 = vpack.c.bf16 %v737_v20, %v735_v16  ;;  %v1293_v26 = vpack.c.bf16 %v790_v22, %v788_v18  ;;  %v739_v28 = vadd.f32 %v738_v23, %v331_v0  ;;  %v792_v31 = vadd.f32 %v791_v25, %v339_v12 }
 0x142   : > { %v740_v27 = vpop.f32.mrf.mxu0  ;;  %v793_v30 = vpop.f32.mrf.mxu1 }
 0x143   : > { %960 = vst [vmem:[%s1788_s23] sm:$0xff] %v1292_v24  ;;  %v741_v29 = vadd.f32 %v740_v27, %v335_v13  ;;  %961 = vst [vmem:[%s1788_s23 + $0x8] sm:$0xff] %v1293_v26  ;;  %v794_v32 = vadd.f32 %v793_v30, %v343_v15 }
 0x144   : > { %v744_v33 = vpop.f32.mrf.mxu0  ;;  %v797_v36 = vpop.f32.mrf.mxu1 }
 0x145   : > { %v1294_v34 = vpack.c.bf16 %v741_v29, %v739_v28  ;;  %v745_v35 = vadd.f32 %v744_v33, %v331_v0  ;;  %v1295_v37 = vpack.c.bf16 %v794_v32, %v792_v31  ;;  %v798_v38 = vadd.f32 %v797_v36, %v339_v12 }
 0x146   : > { %v746_v39 = vpop.f32.mrf.mxu0  ;;  %v799_v41 = vpop.f32.mrf.mxu1 }
 0x147   : > { %962 = vst [vmem:[%s1788_s23 + $0x10] sm:$0xff] %v1294_v34  ;;  %v747_v40 = vadd.f32 %v746_v39, %v335_v13  ;;  %963 = vst [vmem:[%s1788_s23 + $0x18] sm:$0xff] %v1295_v37  ;;  %v800_v42 = vadd.f32 %v799_v41, %v343_v15 }
 0x148   : > { %v748_v43 = vpop.f32.mrf.mxu0  ;;  %v801_v46 = vpop.f32.mrf.mxu1 }
 0x149   : > { %v1296_v44 = vpack.c.bf16 %v747_v40, %v745_v35  ;;  %v749_v45 = vadd.f32 %v748_v43, %v331_v0  ;;  %v1297_v47 = vpack.c.bf16 %v800_v42, %v798_v38  ;;  %v802_v48 = vadd.f32 %v801_v46, %v339_v12 }
 0x14a   : > { %v750_v49 = vpop.f32.mrf.mxu0  ;;  %v803_v51 = vpop.f32.mrf.mxu1 }
 0x14b   : > { %964 = vst [vmem:[%s1788_s23 + $0x20] sm:$0xff] %v1296_v44  ;;  %v751_v50 = vadd.f32 %v750_v49, %v335_v13  ;;  %965 = vst [vmem:[%s1788_s23 + $0x28] sm:$0xff] %v1297_v47  ;;  %v804_v52 = vadd.f32 %v803_v51, %v343_v15 }
 0x14d   : > { %v1298_v53 = vpack.c.bf16 %v751_v50, %v749_v45  ;;  %v1299_v54 = vpack.c.bf16 %v804_v52, %v802_v48 }
 0x14f   : > { %966 = vst [vmem:[%s1788_s23 + $0x30] sm:$0xff] %v1298_v53  ;;  %967 = vst [vmem:[%s1788_s23 + $0x38] sm:$0xff] %v1299_v54 }
 0x150   : > { %1486 = shalt.err (!%p1483_p9)
}
 0x151   : > { %s1487_s8 = scalar_lea.hbm %s1805_s25, 1024  ;;  %s1491_s13 = scalar_lea.hbm %s1910_s3, 2048 }
 0x152   : > { %p1488_p13 = scmp.ne.s32.totalorder %s1805_s25, %s1487_s8  ;;  %p1492_p4 = scmp.lt.s32.totalorder %s1805_s25, %s1910_s3 }
 0x153   : > { %p1493_p8 = scmp.lt.s32.totalorder %s1491_s13, %s1487_s8 }
 0x154   : > { %p1489_p5 = pnand %p1488_p13, %p1927_p10 }
 0x155   : > { %p1494_p3 = por %p1493_p8, %p1492_p4 }
 0x156   : > { %p1490_p0 = pneg %p1489_p5 }
 0x158   : > { %p1495_p11 = pnand %p1494_p3, %p1490_p0 }
 0x15a   : > { %1498 = shalt.err (!%p1495_p11)
}
 0x15b   : > { %s1582_s7 = smov 256   ;;  %s1583_s26 = smov 16   ;;  %v346_v55 = vsub.s32 4, %v1773_v6  ;;  %v350_v56 = vsub.s32 5, %v1773_v6  ;;  %v354_v57 = vsub.s32 6, %v1773_v6  ;;  %v358_v58 = vsub.s32 7, %v1773_v6 }
 0x15c   : > { %1322 = dma.vmem_to_hbm [thread:$0]  (%p1927_p10), %s1797_s29, 1024, %s1805_s25, %s1025_s24, %s1582_s7, %s1582_s7, %s1583_s26   ;;  %v840_v61 = vpop.f32.mrf.mxu0  ;;  %v893_v1 = vpop.f32.mrf.mxu1 }
 0x15d   : > { %v347_v59 = vrot.slane %v1776_v8, %v346_v55  ;;  %v351_v60 = vrot.slane %v1776_v8, %v350_v56  ;;  %v355_v62 = vrot.slane %v1776_v8, %v354_v57  ;;  %v359_v63 = vrot.slane %v1776_v8, %v358_v58  ;;  %s1845_s29 = scalar_lea.vmem [#allocation9], %s1197_s21  ;;  %s1861_s27 = scalar_lea.hbm %s1911_s4, %s1309_s5 }
 0x15e   : > { %v842_v2 = vpop.f32.mrf.mxu0  ;;  %v895_v5 = vpop.f32.mrf.mxu1  ;;  %s1061_s21 = sshll.u32 %s1845_s29, 4  ;;  %s1030_s28 = scalar_lea.sflag [#allocation10], %s1737_s9  ;;  %s1854_s21 = int_to_ptr.vmem [resolvable:$true] %s1061_s21 }
 0x15f   : > { %v841_v3 = vadd.f32 %v840_v61, %v347_v59  ;;  %v843_v4 = vadd.f32 %v842_v2, %v351_v60  ;;  %v894_v7 = vadd.f32 %v893_v1, %v355_v62  ;;  %v896_v9 = vadd.f32 %v895_v5, %v359_v63  ;;  %s1499_s30 = scalar_lea.vmem %s1854_s21, 1024  ;;  %s1584_s8 = smov [#allocation9]  }
 0x160   : > { %v844_v10 = vpop.f32.mrf.mxu0  ;;  %v897_v6 = vpop.f32.mrf.mxu1  ;;  %p1500_p1 = scmp.ne.s32.totalorder %s1854_s21, %s1499_s30  ;;  %s1503_s10 = sshll.u32 %s1584_s8, 4  ;;  %s1504_s10 = int_to_ptr.vmem [resolvable:$false] %s1503_s10 }
 0x161   : > { %v1300_v11 = vpack.c.bf16 %v843_v4, %v841_v3  ;;  %v1301_v0 = vpack.c.bf16 %v896_v9, %v894_v7  ;;  %v845_v8 = vadd.f32 %v844_v10, %v347_v59  ;;  %v898_v15 = vadd.f32 %v897_v6, %v355_v62  ;;  %s1505_s12 = scalar_lea.vmem %s1504_s10, 2048  ;;  %p1506_p12 = scmp.lt.s32.totalorder %s1854_s21, %s1504_s10 }
 0x162   : > { %v846_v12 = vpop.f32.mrf.mxu0  ;;  %v899_v14 = vpop.f32.mrf.mxu1  ;;  %p1501_p2 = pnand %p1500_p1, %p1927_p10  ;;  %p1507_p7 = scmp.lt.s32.totalorder %s1505_s12, %s1499_s30 }
 0x163   : > { %1016 = vst [vmem:[%s1845_s29] sm:$0xff] %v1300_v11  ;;  %v847_v13 = vadd.f32 %v846_v12, %v351_v60  ;;  %1017 = vst [vmem:[%s1845_s29 + $0x8] sm:$0xff] %v1301_v0  ;;  %v900_v16 = vadd.f32 %v899_v14, %v359_v63 }
 0x164   : > { %v850_v17 = vpop.f32.mrf.mxu0  ;;  %v903_v19 = vpop.f32.mrf.mxu1  ;;  %p1502_p6 = pneg %p1501_p2  ;;  %p1508_p9 = por %p1507_p7, %p1506_p12 }
 0x165   : > { %v1302_v18 = vpack.c.bf16 %v847_v13, %v845_v8  ;;  %v1303_v20 = vpack.c.bf16 %v900_v16, %v898_v15  ;;  %v851_v22 = vadd.f32 %v850_v17, %v347_v59  ;;  %v904_v25 = vadd.f32 %v903_v19, %v355_v62 }
 0x166   : > { %v852_v21 = vpop.f32.mrf.mxu0  ;;  %v905_v24 = vpop.f32.mrf.mxu1  ;;  %p1509_p13 = pnand %p1508_p9, %p1502_p6 }
 0x167   : > { %1018 = vst [vmem:[%s1845_s29 + $0x10] sm:$0xff] %v1302_v18  ;;  %v853_v23 = vadd.f32 %v852_v21, %v351_v60  ;;  %1019 = vst [vmem:[%s1845_s29 + $0x18] sm:$0xff] %v1303_v20  ;;  %v906_v26 = vadd.f32 %v905_v24, %v359_v63 }
 0x168   : > { %v854_v27 = vpop.f32.mrf.mxu0  ;;  %v907_v29 = vpop.f32.mrf.mxu1 }
 0x169   : > { %v1304_v28 = vpack.c.bf16 %v853_v23, %v851_v22  ;;  %v1305_v30 = vpack.c.bf16 %v906_v26, %v904_v25  ;;  %v855_v32 = vadd.f32 %v854_v27, %v347_v59  ;;  %v908_v35 = vadd.f32 %v907_v29, %v355_v62 }
 0x16a   : > { %v856_v31 = vpop.f32.mrf.mxu0  ;;  %v909_v34 = vpop.f32.mrf.mxu1 }
 0x16b   : > { %1020 = vst [vmem:[%s1845_s29 + $0x20] sm:$0xff] %v1304_v28  ;;  %v857_v33 = vadd.f32 %v856_v31, %v351_v60  ;;  %1021 = vst [vmem:[%s1845_s29 + $0x28] sm:$0xff] %v1305_v30  ;;  %v910_v36 = vadd.f32 %v909_v34, %v359_v63 }
 0x16d   : > { %v1306_v37 = vpack.c.bf16 %v857_v33, %v855_v32  ;;  %v1307_v38 = vpack.c.bf16 %v910_v36, %v908_v35 }
 0x16f   : > { %1022 = vst [vmem:[%s1845_s29 + $0x30] sm:$0xff] %v1306_v37  ;;  %1023 = vst [vmem:[%s1845_s29 + $0x38] sm:$0xff] %v1307_v38 }
 0x170   : > { %1512 = shalt.err (!%p1509_p13)
}
 0x171   : > { %s1513_s19 = scalar_lea.hbm %s1861_s27, 1024  ;;  %s1517_s13 = scalar_lea.hbm %s1911_s4, 2048 }
 0x172   : > { %p1514_p5 = scmp.ne.s32.totalorder %s1861_s27, %s1513_s19  ;;  %p1518_p8 = scmp.lt.s32.totalorder %s1861_s27, %s1911_s4 }
 0x173   : > { %p1519_p3 = scmp.lt.s32.totalorder %s1517_s13, %s1513_s19 }
 0x174   : > { %p1515_p0 = pnand %p1514_p5, %p1927_p10 }
 0x175   : > { %p1520_p11 = por %p1519_p3, %p1518_p8 }
 0x176   : > { %p1516_p4 = pneg %p1515_p0 }
 0x178   : > { %p1521_p1 = pnand %p1520_p11, %p1516_p4 }
 0x17a   : > { %1524 = shalt.err (!%p1521_p1)
}
 0x17b   : > { %1323 = dma.vmem_to_hbm [thread:$0]  (%p1927_p10), %s1854_s21, 1024, %s1861_s27, %s1030_s28, %s1582_s7, %s1582_s7, %s1583_s26  }
 0x17c PF: > { %s1076_s29 = sand.u32 1, %s1559_s15   ;;  %p1928_p2 = scmp.ne.s32.totalorder %s1917_s22, 0 }
 0x17d   : > { %p1929_p6 = scmp.ge.s32.totalorder %s1571_s18, 2  ;;  %s1077_s25 = scalar_lea.sflag [#allocation4], %s1076_s29 }
 0x17f   : > { %p1338_p12 = pnand %p1929_p6, %p1928_p2 }
 0x181   : > { %p1339_p7 = pneg %p1338_p12 }
 0x183   : > { %1550 = dma.done.wait (%p1339_p7), %s1077_s25, 1024  }
 0x184   : > { %1552 = vsyncadd (%p1339_p7), %s1077_s25, 4294966272  ;;  %s1086_s24 = scalar_lea.sflag [#allocation10], %s1076_s29 }
 0x185   : > { %1554 = dma.done.wait (%p1339_p7), %s1086_s24, 1024  }
 0x186   : > { %1556 = vsyncadd (%p1339_p7), %s1086_s24, 4294966272  ;;  %p22_p10 = scmp.ge.s32.totalorder %s1682_s11, 4   ;;  %s1930_s15 = smov %s1563_s16 }
 0x187   : > { %s1931_s16 = smov %s1567_s17  ;;  %s1932_s17 = smov %s1698_s20 }
 0x188   : > { %s1933_s18 = smov %s1682_s11  ;;  %24 = sbr.rel (!%p22_p10) target bundleno = 8 (0x8), region = 102 }
 0x18d   :  { %1091 = vsyncpa [#allocation3], 1 }
 0x18e   :  { %1093 = vsyncpa [#allocation3 + $0x1], 1 }
 0x18f   :  { %1094 = vsyncpa [#allocation6], 1 }
 0x190   :  { %1095 = vsyncpa [#allocation4], 1 }
 0x191   :  { %1097 = vsyncpa [#allocation4 + $0x1], 1 }
 0x192   :  { %1098 = vsyncpa [#allocation10], 1 }
 0x193   :  { %1100 = vsyncpa [#allocation10 + $0x1], 1 }

</bundles_post_ra>
